<compile_context>
chip_gen: v7x
topology: tpu7x:2x2x1
jax: 0.10.0
libtpu: 0.0.40
codegen_flags: <defaults>
</compile_context>

<pallas_src>
import jax
import jax.numpy as jnp
from jax.experimental import pallas as pl
from jax.experimental.pallas import tpu as pltpu


def _round_up(x, m):
    return (x + m - 1) // m * m


def _disc_mlp_kernel(x_img_ref, x_lbl_ref,
                     w1i_ref, w1l_ref, b1_ref,
                     w2_ref, b2_ref,
                     w3_ref, b3_ref,
                     w4t_ref, b4_ref,
                     out_ref):
    """One batch tile of the MLP: (Linear -> LeakyReLU) x3 -> Linear -> Sigmoid."""

    def leaky_relu(v):
        # maximum(v, 0.2*v) == LeakyReLU(0.2) since the slope is in (0, 1).
        return jnp.maximum(v, 0.2 * v)

    # Layer 1: image-part matmul + label-part matmul (concat folded into a sum).
    h = (jnp.dot(x_img_ref[...], w1i_ref[...], preferred_element_type=jnp.float32)
         + jnp.dot(x_lbl_ref[...], w1l_ref[...], preferred_element_type=jnp.float32)
         + b1_ref[...])
    h = leaky_relu(h)
    # Dropout(0.3) -> identity in eval mode.

    # Layer 2
    h = leaky_relu(jnp.dot(h, w2_ref[...], preferred_element_type=jnp.float32)
                   + b2_ref[...])

    # Layer 3
    h = leaky_relu(jnp.dot(h, w3_ref[...], preferred_element_type=jnp.float32)
                   + b3_ref[...])

    # Layer 4 has out_features == 1: VPU multiply + lane reduce instead of a
    # lane-width-1 MXU matmul.  b4 is a scalar read from SMEM.
    logit = jnp.sum(h * w4t_ref[...], axis=-1) + b4_ref[0]      # (TM,)
    # Lane-dense store: one full (TM,) row per grid step.
    out_ref[0, 0, :] = jax.nn.sigmoid(logit)


def prepare_params(params):
    """One-time weight preprocessing (call OUTSIDE the jitted forward).

    Splits w1 into image/label parts, pads the label-embedding table and all
    hidden (output-feature) dims up to lane width 128, and transposes w4.
    All padding is with zeros, which is numerically exact through the
    Linear+LeakyReLU stack (padded columns stay exactly 0 downstream).
    """
    emb = params["embedding"].astype(jnp.float32)
    w1 = params["w1"].astype(jnp.float32)
    n_cls = emb.shape[1]
    d_img = w1.shape[0] - n_cls

    h4 = params["w2"].shape[0]
    h2 = params["w3"].shape[0]
    h1 = params["w4"].shape[0]
    h4p, h2p, h1p = (_round_up(d, 128) for d in (h4, h2, h1))
    n_cls_p = _round_up(n_cls, 128)

    def pad2(a, rows, cols):
        a = a.astype(jnp.float32)
        return jnp.pad(a, ((0, rows - a.shape[0]), (0, cols - a.shape[1])))

    # NOTE: an optional bf16 cast of the weights / activations (keeping f32
    # accumulation) would double MXU throughput and halve HBM/VMEM traffic,
    # but is skipped here to preserve f32-level parity with the reference.
    return {
        # Embedding table padded once so the per-call gather is already
        # lane-dense (no per-call jnp.pad of the label activations).
        "embedding": pad2(emb, emb.shape[0], n_cls_p),
        "w1_img": pad2(w1[:d_img], d_img, h4p),
        "w1_lbl": pad2(w1[d_img:], n_cls_p, h4p),
        "b1": pad2(params["b1"], 1, h4p),
        "w2": pad2(params["w2"], h4p, h2p),
        "b2": pad2(params["b2"], 1, h2p),
        "w3": pad2(params["w3"], h2p, h1p),
        "b3": pad2(params["b3"], 1, h1p),
        "w4t": pad2(params["w4"].T, 1, h1p),
        "b4": params["b4"].reshape(1).astype(jnp.float32),
    }


def discriminator_forward(img, labels, prepared):
    """img: [B, C, H, W] float32 (NCHW), labels: [B] int32, prepared: prepare_params()."""
    B = img.shape[0]

    # Glue: flatten (matches torch img.view(B, -1) on NCHW) + embedding lookup.
    img_flat = img.reshape(B, -1).astype(jnp.float32)
    d_img = img_flat.shape[1]
    x_lbl = jnp.take(prepared["embedding"], labels, axis=0)     # [B, n_cls_p]
    n_cls_p = x_lbl.shape[1]

    # Batch tiling: sublane-aligned for small B; 256/512 for large B so that
    # per-step overhead is amortized and v7x gets >= 2 grid steps to shard
    # across its two TensorCores.
    if B <= 256:
        tm = _round_up(max(B, 1), 8)
    elif B <= 1024:
        tm = 256
    else:
        tm = 512
    b_pad = _round_up(B, tm)
    if b_pad != B:  # pad batch only when needed
        img_flat = jnp.pad(img_flat, ((0, b_pad - B), (0, 0)))
        x_lbl = jnp.pad(x_lbl, ((0, b_pad - B), (0, 0)))
    num_tiles = b_pad // tm

    w1i, w1l = prepared["w1_img"], prepared["w1_lbl"]
    b1, b2, b3 = prepared["b1"], prepared["b2"], prepared["b3"]
    w2, w3 = prepared["w2"], prepared["w3"]
    w4t, b4 = prepared["w4t"], prepared["b4"]

    # TODO(synk): for very large w1 (>~20-30 MiB, e.g. big images) on v7x
    # (64 MiB VMEM), split d_img over an 'arbitrary' K grid axis with a VMEM
    # accumulator instead of keeping w1 fully resident.

    def resident(arr):
        # Constant-index full-array block: DMA'd once, stays in VMEM.
        # Single-buffered (the block never changes), halving its VMEM footprint.
        return pl.BlockSpec(arr.shape, lambda i, _nd=arr.ndim: (0,) * _nd,
                            pipeline_mode=pl.Buffered(1))

    # Explicit VMEM budget: single-buffered weights + double-buffered x tiles
    # + intermediate-activation headroom.
    def nbytes(a):
        return int(a.size) * a.dtype.itemsize

    weight_bytes = sum(nbytes(a) for a in (w1i, w1l, b1, w2, b2, w3, b3, w4t))
    io_bytes = 2 * tm * (d_img + n_cls_p) * 4 + 2 * tm * 4
    act_bytes = 4 * tm * max(w1i.shape[1], 128) * 4
    vmem_limit = int(min(64 << 20, weight_bytes + io_bytes + act_bytes + (8 << 20)))

    out = pl.pallas_call(
        _disc_mlp_kernel,
        out_shape=jax.ShapeDtypeStruct((num_tiles, 1, tm), jnp.float32),
        grid=(num_tiles,),
        in_specs=[
            pl.BlockSpec((tm, d_img), lambda i: (i, 0)),     # image activations (tiled)
            pl.BlockSpec((tm, n_cls_p), lambda i: (i, 0)),   # label activations (tiled)
            resident(w1i), resident(w1l), resident(b1),
            resident(w2), resident(b2),
            resident(w3), resident(b3),
            resident(w4t),
            pl.BlockSpec(memory_space=pltpu.MemorySpace.SMEM),   # b4 scalar
        ],
        out_specs=pl.BlockSpec((1, 1, tm), lambda i: (i, 0, 0)),  # lane-dense rows
        compiler_params=pltpu.CompilerParams(
            dimension_semantics=("parallel",),       # megacore sharding on v7x
            vmem_limit_bytes=vmem_limit),
    )(img_flat, x_lbl, w1i, w1l, b1, w2, b2, w3, b3, w4t, b4)

    return out.reshape(b_pad, 1)[:B]


def init_params(key, num_classes, img_channels, img_size, hidden_dim):
    """Deterministic PyTorch-style (uniform +-1/sqrt(fan_in)) init."""
    input_dim = img_channels * img_size * img_size + num_classes
    dims = [
        (input_dim, hidden_dim * 4),
        (hidden_dim * 4, hidden_dim * 2),
        (hidden_dim * 2, hidden_dim),
        (hidden_dim, 1),
    ]
    keys = jax.random.split(key, 2 * len(dims) + 1)
    params = {}
    # nn.Embedding default init: N(0, 1)
    params["embedding"] = jax.random.normal(
        keys[0], (num_classes, num_classes), dtype=jnp.float32)
    for i, (fan_in, fan_out) in enumerate(dims):
        bound = 1.0 / (fan_in ** 0.5)
        params[f"w{i+1}"] = jax.random.uniform(
            keys[2 * i + 1], (fan_in, fan_out), jnp.float32, -bound, bound)
        params[f"b{i+1}"] = jax.random.uniform(
            keys[2 * i + 2], (1, fan_out), jnp.float32, -bound, bound)
    return params


def reference_forward(img, labels, params):
    """Pure-JAX reference for correctness checking (matches the torch module)."""
    B = img.shape[0]
    x = jnp.concatenate(
        [img.reshape(B, -1), jnp.take(params["embedding"], labels, axis=0)], axis=1)

    def lrelu(v):
        return jnp.where(v > 0, v, 0.2 * v)

    h = lrelu(x @ params["w1"] + params["b1"])
    h = lrelu(h @ params["w2"] + params["b2"])
    h = lrelu(h @ params["w3"] + params["b3"])
    return jax.nn.sigmoid(h @ params["w4"] + params["b4"])


if __name__ == "__main__":
    # Small shapes consistent with the module's forward.
    num_classes = 10
    img_channels = 1
    img_size = 16
    hidden_dim = 32
    batch = 2

    key = jax.random.PRNGKey(0)
    k_params, k_img, k_lbl = jax.random.split(key, 3)

    params = init_params(k_params, num_classes, img_channels, img_size, hidden_dim)
    prepared = prepare_params(params)          # one-time weight prep, outside jit

    img = jax.random.normal(
        k_img, (batch, img_channels, img_size, img_size), dtype=jnp.float32)
    labels = jax.random.randint(k_lbl, (batch,), 0, num_classes, dtype=jnp.int32)

    forward = jax.jit(discriminator_forward)
    validity = forward(img, labels, prepared)
    validity = jax.block_until_ready(validity)

    ref = reference_forward(img, labels, params)
    assert validity.shape == (batch, 1)
    assert jnp.allclose(validity, ref, atol=1e-5, rtol=1e-5)

    # TODO(synk): Dropout(0.3) is implemented with eval-mode (identity) semantics;
    # training-mode stochastic dropout would need pltpu.prng_* inside the kernel.

    print("KERNEL_OK")
</pallas_src>

<mosaic_0001>
module attributes {stable_mosaic.version = 11 : i64} {
  func.func @_disc_mlp_kernel(%arg0: i32, %arg1: memref<8x256xf32, #tpu.memory_space<vmem>>, %arg2: memref<8x128xf32, #tpu.memory_space<vmem>>, %arg3: memref<256x128xf32, #tpu.memory_space<vmem>>, %arg4: memref<128x128xf32, #tpu.memory_space<vmem>>, %arg5: memref<1x128xf32, #tpu.memory_space<vmem>>, %arg6: memref<128x128xf32, #tpu.memory_space<vmem>>, %arg7: memref<1x128xf32, #tpu.memory_space<vmem>>, %arg8: memref<128x128xf32, #tpu.memory_space<vmem>>, %arg9: memref<1x128xf32, #tpu.memory_space<vmem>>, %arg10: memref<1x128xf32, #tpu.memory_space<vmem>>, %arg11: memref<1xf32, #tpu.memory_space<smem>>, %arg12: memref<1x1x8xf32, #tpu.memory_space<vmem>>) attributes {dimension_semantics = [#tpu.dimension_semantics<parallel>], iteration_bounds = array<i64: 1>, scalar_prefetch = 0 : i64, scratch_operands = 0 : i64, tpu.core_type = #tpu.core_type<tc>, window_params = [{transform_indices = @transform_0, window_bounds = array<i64: 8, 256>}, {transform_indices = @transform_1, window_bounds = array<i64: 8, 128>}, {pipeline_mode = #tpu.pipeline_mode<synchronous>, transform_indices = @transform_2, window_bounds = array<i64: 256, 128>}, {pipeline_mode = #tpu.pipeline_mode<synchronous>, transform_indices = @transform_3, window_bounds = array<i64: 128, 128>}, {pipeline_mode = #tpu.pipeline_mode<synchronous>, transform_indices = @transform_4, window_bounds = array<i64: 1, 128>}, {pipeline_mode = #tpu.pipeline_mode<synchronous>, transform_indices = @transform_5, window_bounds = array<i64: 128, 128>}, {pipeline_mode = #tpu.pipeline_mode<synchronous>, transform_indices = @transform_6, window_bounds = array<i64: 1, 128>}, {pipeline_mode = #tpu.pipeline_mode<synchronous>, transform_indices = @transform_7, window_bounds = array<i64: 128, 128>}, {pipeline_mode = #tpu.pipeline_mode<synchronous>, transform_indices = @transform_8, window_bounds = array<i64: 1, 128>}, {pipeline_mode = #tpu.pipeline_mode<synchronous>, transform_indices = @transform_9, window_bounds = array<i64: 1, 128>}, {transform_indices = @transform_10, window_bounds = array<i64: 1>}, {transform_indices = @transform_11, window_bounds = array<i64: 1, 1, 8>}]} {
    %c0 = arith.constant 0 : index
    %c0_0 = arith.constant 0 : index
    %0 = vector.load %arg1[%c0, %c0_0] : memref<8x256xf32, #tpu.memory_space<vmem>>, vector<8x256xf32>
    %c0_1 = arith.constant 0 : index
    %c0_2 = arith.constant 0 : index
    %1 = vector.load %arg3[%c0_1, %c0_2] : memref<256x128xf32, #tpu.memory_space<vmem>>, vector<256x128xf32>
    %cst = arith.constant dense<0.000000e+00> : vector<8x128xf32>
    %2 = tpu.matmul %0, %1, %cst {dimension_numbers = #tpu.dot_dimension_numbers<[1], [0], [0], [1], [0, 0, 1, 1], [], []>} : vector<8x256xf32>, vector<256x128xf32>, vector<8x128xf32> -> vector<8x128xf32>
    %c0_3 = arith.constant 0 : index
    %c0_4 = arith.constant 0 : index
    %3 = vector.load %arg2[%c0_3, %c0_4] : memref<8x128xf32, #tpu.memory_space<vmem>>, vector<8x128xf32>
    %c0_5 = arith.constant 0 : index
    %c0_6 = arith.constant 0 : index
    %4 = vector.load %arg4[%c0_5, %c0_6] : memref<128x128xf32, #tpu.memory_space<vmem>>, vector<128x128xf32>
    %cst_7 = arith.constant dense<0.000000e+00> : vector<8x128xf32>
    %5 = tpu.matmul %3, %4, %cst_7 {dimension_numbers = #tpu.dot_dimension_numbers<[1], [0], [0], [1], [0, 0, 1, 1], [], []>} : vector<8x128xf32>, vector<128x128xf32>, vector<8x128xf32> -> vector<8x128xf32>
    %6 = arith.addf %2, %5 : vector<8x128xf32>
    %c0_8 = arith.constant 0 : index
    %c0_9 = arith.constant 0 : index
    %7 = vector.load %arg5[%c0_8, %c0_9] : memref<1x128xf32, #tpu.memory_space<vmem>>, vector<1x128xf32>
    %8 = vector.broadcast %7 : vector<1x128xf32> to vector<8x128xf32>
    %9 = arith.addf %6, %8 : vector<8x128xf32>
    %cst_10 = arith.constant 2.000000e-01 : f32
    %10 = vector.broadcast %cst_10 : f32 to vector<8x128xf32>
    %11 = arith.mulf %10, %9 : vector<8x128xf32>
    %12 = arith.maximumf %9, %11 : vector<8x128xf32>
    %c0_11 = arith.constant 0 : index
    %c0_12 = arith.constant 0 : index
    %13 = vector.load %arg6[%c0_11, %c0_12] : memref<128x128xf32, #tpu.memory_space<vmem>>, vector<128x128xf32>
    %cst_13 = arith.constant dense<0.000000e+00> : vector<8x128xf32>
    %14 = tpu.matmul %12, %13, %cst_13 {dimension_numbers = #tpu.dot_dimension_numbers<[1], [0], [0], [1], [0, 0, 1, 1], [], []>} : vector<8x128xf32>, vector<128x128xf32>, vector<8x128xf32> -> vector<8x128xf32>
    %c0_14 = arith.constant 0 : index
    %c0_15 = arith.constant 0 : index
    %15 = vector.load %arg7[%c0_14, %c0_15] : memref<1x128xf32, #tpu.memory_space<vmem>>, vector<1x128xf32>
    %16 = vector.broadcast %15 : vector<1x128xf32> to vector<8x128xf32>
    %17 = arith.addf %14, %16 : vector<8x128xf32>
    %cst_16 = arith.constant 2.000000e-01 : f32
    %18 = vector.broadcast %cst_16 : f32 to vector<8x128xf32>
    %19 = arith.mulf %18, %17 : vector<8x128xf32>
    %20 = arith.maximumf %17, %19 : vector<8x128xf32>
    %c0_17 = arith.constant 0 : index
    %c0_18 = arith.constant 0 : index
    %21 = vector.load %arg8[%c0_17, %c0_18] : memref<128x128xf32, #tpu.memory_space<vmem>>, vector<128x128xf32>
    %cst_19 = arith.constant dense<0.000000e+00> : vector<8x128xf32>
    %22 = tpu.matmul %20, %21, %cst_19 {dimension_numbers = #tpu.dot_dimension_numbers<[1], [0], [0], [1], [0, 0, 1, 1], [], []>} : vector<8x128xf32>, vector<128x128xf32>, vector<8x128xf32> -> vector<8x128xf32>
    %c0_20 = arith.constant 0 : index
    %c0_21 = arith.constant 0 : index
    %23 = vector.load %arg9[%c0_20, %c0_21] : memref<1x128xf32, #tpu.memory_space<vmem>>, vector<1x128xf32>
    %24 = vector.broadcast %23 : vector<1x128xf32> to vector<8x128xf32>
    %25 = arith.addf %22, %24 : vector<8x128xf32>
    %cst_22 = arith.constant 2.000000e-01 : f32
    %26 = vector.broadcast %cst_22 : f32 to vector<8x128xf32>
    %27 = arith.mulf %26, %25 : vector<8x128xf32>
    %28 = arith.maximumf %25, %27 : vector<8x128xf32>
    %c0_23 = arith.constant 0 : index
    %c0_24 = arith.constant 0 : index
    %29 = vector.load %arg10[%c0_23, %c0_24] : memref<1x128xf32, #tpu.memory_space<vmem>>, vector<1x128xf32>
    %30 = vector.broadcast %29 : vector<1x128xf32> to vector<8x128xf32>
    %31 = arith.mulf %28, %30 : vector<8x128xf32>
    %cst_25 = arith.constant dense<0.000000e+00> : vector<8xf32>
    %32 = vector.multi_reduction <add>, %31, %cst_25 [1] : vector<8x128xf32> to vector<8xf32>
    %c0_26 = arith.constant 0 : index
    %33 = memref.load %arg11[%c0_26] : memref<1xf32, #tpu.memory_space<smem>>
    %34 = vector.broadcast %33 : f32 to vector<8xf32>
    %35 = arith.addf %32, %34 : vector<8xf32>
    %36 = arith.negf %35 : vector<8xf32>
    %37 = math.exp %36 : vector<8xf32>
    %cst_27 = arith.constant 1.000000e+00 : f32
    %38 = vector.broadcast %cst_27 : f32 to vector<8xf32>
    %39 = arith.addf %38, %37 : vector<8xf32>
    %40 = arith.divf %38, %39 : vector<8xf32>
    %c0_28 = arith.constant 0 : index
    %c0_29 = arith.constant 0 : index
    %c0_30 = arith.constant 0 : index
    %41 = vector.load %arg12[%c0_28, %c0_29, %c0_30] : memref<1x1x8xf32, #tpu.memory_space<vmem>>, vector<1x1x8xf32>
    %42 = vector.shape_cast %41 : vector<1x1x8xf32> to vector<8xf32>
    %43 = vector.shape_cast %40 : vector<8xf32> to vector<1x1x8xf32>
    tpu.vector_store %arg12[%c0_28, %c0_29, %c0_30], %43 {strides = array<i32>} : memref<1x1x8xf32, #tpu.memory_space<vmem>>, vector<1x1x8xf32>,
    return
  }
  func.func @transform_0(%arg0: i32) -> (i32, i32) {
    %c0_i32 = arith.constant 0 : i32
    %c0_i32_0 = arith.constant 0 : i32
    return %arg0, %c0_i32 : i32, i32
  }
  func.func @transform_1(%arg0: i32) -> (i32, i32) {
    %c0_i32 = arith.constant 0 : i32
    %c0_i32_0 = arith.constant 0 : i32
    return %arg0, %c0_i32 : i32, i32
  }
  func.func @transform_2(%arg0: i32) -> (i32, i32) {
    %c0_i32 = arith.constant 0 : i32
    %c0_i32_0 = arith.constant 0 : i32
    %c0_i32_1 = arith.constant 0 : i32
    return %c0_i32, %c0_i32_0 : i32, i32
  }
  func.func @transform_3(%arg0: i32) -> (i32, i32) {
    %c0_i32 = arith.constant 0 : i32
    %c0_i32_0 = arith.constant 0 : i32
    %c0_i32_1 = arith.constant 0 : i32
    return %c0_i32, %c0_i32_0 : i32, i32
  }
  func.func @transform_4(%arg0: i32) -> (i32, i32) {
    %c0_i32 = arith.constant 0 : i32
    %c0_i32_0 = arith.constant 0 : i32
    %c0_i32_1 = arith.constant 0 : i32
    return %c0_i32, %c0_i32_0 : i32, i32
  }
  func.func @transform_5(%arg0: i32) -> (i32, i32) {
    %c0_i32 = arith.constant 0 : i32
    %c0_i32_0 = arith.constant 0 : i32
    %c0_i32_1 = arith.constant 0 : i32
    return %c0_i32, %c0_i32_0 : i32, i32
  }
  func.func @transform_6(%arg0: i32) -> (i32, i32) {
    %c0_i32 = arith.constant 0 : i32
    %c0_i32_0 = arith.constant 0 : i32
    %c0_i32_1 = arith.constant 0 : i32
    return %c0_i32, %c0_i32_0 : i32, i32
  }
  func.func @transform_7(%arg0: i32) -> (i32, i32) {
    %c0_i32 = arith.constant 0 : i32
    %c0_i32_0 = arith.constant 0 : i32
    %c0_i32_1 = arith.constant 0 : i32
    return %c0_i32, %c0_i32_0 : i32, i32
  }
  func.func @transform_8(%arg0: i32) -> (i32, i32) {
    %c0_i32 = arith.constant 0 : i32
    %c0_i32_0 = arith.constant 0 : i32
    %c0_i32_1 = arith.constant 0 : i32
    return %c0_i32, %c0_i32_0 : i32, i32
  }
  func.func @transform_9(%arg0: i32) -> (i32, i32) {
    %c0_i32 = arith.constant 0 : i32
    %c0_i32_0 = arith.constant 0 : i32
    %c0_i32_1 = arith.constant 0 : i32
    return %c0_i32, %c0_i32_0 : i32, i32
  }
  func.func @transform_10(%arg0: i32) -> i32 {
    %c0_i32 = arith.constant 0 : i32
    %c0_i32_0 = arith.constant 0 : i32
    return %c0_i32 : i32
  }
  func.func @transform_11(%arg0: i32) -> (i32, i32, i32) {
    %c0_i32 = arith.constant 0 : i32
    %c0_i32_0 = arith.constant 0 : i32
    %c0_i32_1 = arith.constant 0 : i32
    return %arg0, %c0_i32, %c0_i32_0 : i32, i32, i32
  }
}

</mosaic_0001>

<bundles_post_ra>
// kernel: discriminator_forward.1
= control target key start
LH: loop header
LB: loop body
LE: loop exit
PB: predicated region body
PF: predicated region fallthrough
CT: control target
= control target key end

     0   :  { %17 = vsyncpa [#allocation4], 0  ;;  %s1113_s0 = inlined_call_operand.vmem [shape: f32[8,256], index: 0, kind: input, shape index: {}]   ;;  %s1114_s1 = inlined_call_operand.vmem [shape: f32[8,128], index: 1, kind: input, shape index: {}]   ;;  %s1115_s2 = inlined_call_operand.hbm [shape: f32[256,128], index: 2, kind: input, shape index: {}]   ;;  %s1116_s3 = inlined_call_operand.vmem [shape: f32[128,128], index: 3, kind: input, shape index: {}]   ;;  %s1117_s4 = inlined_call_operand.vmem [shape: f32[1,128], index: 4, kind: input, shape index: {}]   ;;  %s1118_s5 = inlined_call_operand.hbm [shape: f32[128,128], index: 5, kind: input, shape index: {}]   ;;  %s1119_s6 = inlined_call_operand.vmem [shape: f32[1,128], index: 6, kind: input, shape index: {}]   ;;  %s1120_s7 = inlined_call_operand.hbm [shape: f32[128,128], index: 7, kind: input, shape index: {}]   ;;  %s1121_s8 = inlined_call_operand.vmem [shape: f32[1,128], index: 8, kind: input, shape index: {}]   ;;  %s1122_s9 = inlined_call_operand.vmem [shape: f32[1,128], index: 9, kind: input, shape index: {}]   ;;  %s1123_s10 = inlined_call_operand.<no memory space> [shape: f32[1], index: 10, kind: input, shape index: {}]   ;;  %s1124_s11 = inlined_call_operand.vmem [shape: f32[1,1,8], index: 11, kind: output, shape index: {}]  }
   0x1   :  { %18 = vsyncpa [#allocation6], 0  ;;  %s888_s17 = smov [#allocation5]   ;;  %s889_s19 = smov [#allocation3]  }
   0x2   :  { %s44_s18 = sshll.u32 %s888_s17, 4  ;;  %s28_s20 = sshll.u32 %s889_s19, 4  ;;  %s45_s18 = int_to_ptr.vmem [resolvable:$true] %s44_s18  ;;  %s956_s20 = int_to_ptr.vmem [resolvable:$true] %s28_s20 }
   0x3   :  { %s818_s23 = scalar_lea.hbm %s1118_s5, 2048 }
   0x4   :  { %p819_p0 = scmp.ne.s32.totalorder %s1118_s5, %s818_s23  ;;  %p822_p1 = scmp.lt.u32.totalorder %s818_s23, %s1118_s5 }
   0x6   :  { %p824_p2 = pnand %p822_p1, %p819_p0 }
   0x8   :  { %827 = shalt.err (!%p824_p2)
}
   0x9   :  { %s828_s28 = scalar_lea.vmem %s45_s18, 2048  ;;  %p833_p4 = scmp.lt.s32.totalorder %s45_s18, %s45_s18 }
   0xa   :  { %p829_p3 = scmp.ne.s32.totalorder %s45_s18, %s828_s28  ;;  %p834_p5 = scmp.lt.s32.totalorder %s828_s28, %s828_s28 }
   0xc   :  { %p835_p6 = por %p834_p5, %p833_p4 }
   0xe   :  { %p836_p7 = pnand %p835_p6, %p829_p3 }
  0x10   :  { %839 = shalt.err (!%p836_p7)
}
  0x11   :  { %s890_s29 = smov 128   ;;  %s891_s30 = smov 8  }
  0x12   :  { %50 = dma.hbm_to_vmem [thread:$0]  %s1118_s5, 2048, %s45_s18, [#allocation6], %s890_s29, %s890_s29, %s891_s30  }
  0x13   :  { %s840_s16 = scalar_lea.hbm %s1115_s2, 4096 }
  0x14   :  { %p841_p8 = scmp.ne.s32.totalorder %s1115_s2, %s840_s16  ;;  %p844_p9 = scmp.lt.u32.totalorder %s840_s16, %s1115_s2 }
  0x16   :  { %p846_p10 = pnand %p844_p9, %p841_p8 }
  0x18   :  { %849 = shalt.err (!%p846_p10)
}
  0x19   :  { %s850_s23 = scalar_lea.vmem %s956_s20, 4096  ;;  %p855_p12 = scmp.lt.s32.totalorder %s956_s20, %s956_s20 }
  0x1a   :  { %p851_p11 = scmp.ne.s32.totalorder %s956_s20, %s850_s23  ;;  %p856_p13 = scmp.lt.s32.totalorder %s850_s23, %s850_s23 }
  0x1c   :  { %p857_p0 = por %p856_p13, %p855_p12 }
  0x1e   :  { %p858_p1 = pnand %p857_p0, %p851_p11 }
  0x20   :  { %861 = shalt.err (!%p858_p1)
}
  0x21   :  { %34 = dma.hbm_to_vmem [thread:$0]  %s1115_s2, 4096, %s956_s20, [#allocation4], %s890_s29, %s890_s29, %s891_s30  }
  0x22   :  { %s892_s24 = smov [#allocation7]   ;;  %s862_s28 = scalar_lea.hbm %s1120_s7, 2048 }
  0x23   :  { %s58_s25 = sshll.u32 %s892_s24, 4  ;;  %p863_p2 = scmp.ne.s32.totalorder %s1120_s7, %s862_s28  ;;  %s59_s25 = int_to_ptr.vmem [resolvable:$true] %s58_s25 }
  0x24   :  { %p866_p3 = scmp.lt.u32.totalorder %s862_s28, %s1120_s7 }
  0x26   :  { %p868_p4 = pnand %p866_p3, %p863_p2 }
  0x28   :  { %871 = shalt.err (!%p868_p4)
}
  0x29   :  { %s872_s16 = scalar_lea.vmem %s59_s25, 2048  ;;  %p877_p6 = scmp.lt.s32.totalorder %s59_s25, %s59_s25 }
  0x2a   :  { %p873_p5 = scmp.ne.s32.totalorder %s59_s25, %s872_s16  ;;  %p878_p7 = scmp.lt.s32.totalorder %s872_s16, %s872_s16 }
  0x2c   :  { %p879_p8 = por %p878_p7, %p877_p6 }
  0x2e   :  { %p880_p9 = pnand %p879_p8, %p873_p5 }
  0x30   :  { %883 = shalt.err (!%p880_p9)
}
  0x31   :  { %64 = dma.hbm_to_vmem [thread:$0]  %s1120_s7, 2048, %s59_s25, [#allocation6], %s890_s29, %s890_s29, %s891_s30  }
  0x32   :  { %884 = dma.done.wait [#allocation4], 4096  }
  0x33   :  { %885 = vsyncadd [#allocation4], 4294963200 }
  0x34   :  { %886 = dma.done.wait [#allocation6], 4096  }
  0x35   :  { %887 = vsyncadd [#allocation6], 4294963200  ;;  %v893_v0 = vmov 0.0|0.0   ;;  %vm894_vm0 = vmmov 0   ;;  %v895_v1 = vmov 0.0   ;;  %v98_v2 = vld [vmem:[#allocation3 + $0x80] sm:$0xff] }
  0x36   :  { %702 = vmatprep.subr.bf16.mxu0 %v893_v0  ;;  %629 = vmatprep.mubr.msk.f32.mxu0 %vm894_vm0, %v895_v1  ;;  %v99_v3 = vld [vmem:[#allocation3 + $0x88] sm:$0xff]  ;;  %v82_v4 = vld [vmem:[#allocation3] sm:$0xff]  ;;  %v100_v11 = vld [vmem:[#allocation3 + $0x90] sm:$0xff]  ;;  %vm498_vm1 = vcmask 57344  }
  0x37   :  { %v726_v5 = vpack.c.bf16 %v99_v3, %v98_v2  ;;  %v83_v6 = vld [vmem:[#allocation3 + $0x8] sm:$0xff]  ;;  %v115_v7 = vld [vmem:[%s1116_s3] sm:$0xff]  ;;  %v101_v12 = vld [vmem:[#allocation3 + $0x98] sm:$0xff] }
  0x38   :  { %v116_v8 = vld [vmem:[%s1116_s3 + $0x8] sm:$0xff]  ;;  %v728_v9 = vpack.c.bf16 %v83_v6, %v82_v4  ;;  %v84_v13 = vld [vmem:[#allocation3 + $0x10] sm:$0xff]  ;;  %v730_v14 = vpack.c.bf16 %v101_v12, %v100_v11  ;;  %v85_v15 = vld [vmem:[#allocation3 + $0x18] sm:$0xff] }
  0x39   :  { %v703_v10 = vpack.c.bf16 %v116_v8, %v115_v7  ;;  %727 = vmatprep.subr.bf16.mxu1 %v726_v5  ;;  %v117_v16 = vld [vmem:[%s1116_s3 + $0x10] sm:$0xff]  ;;  %v118_v17 = vld [vmem:[%s1116_s3 + $0x18] sm:$0xff]  ;;  %v732_v18 = vpack.c.bf16 %v85_v15, %v84_v13  ;;  %v102_v20 = vld [vmem:[#allocation3 + $0xa0] sm:$0xff] }
  0x3a   :  { %729 = vmatpush3.bf16.msra.mxu1 %v728_v9  ;;  %v706_v19 = vpack.c.bf16 %v118_v17, %v117_v16  ;;  %v103_v21 = vld [vmem:[#allocation3 + $0xa8] sm:$0xff]  ;;  %v86_v22 = vld [vmem:[#allocation3 + $0x20] sm:$0xff]  ;;  %v104_v27 = vld [vmem:[#allocation3 + $0xb0] sm:$0xff] }
  0x3b   :  { %704 = vmatpush3.bf16.msra.mxu0 %v703_v10  ;;  %731 = vmatprep.subr.bf16.mxu1 %v730_v14  ;;  %v734_v23 = vpack.c.bf16 %v103_v21, %v102_v20  ;;  %v87_v24 = vld [vmem:[#allocation3 + $0x28] sm:$0xff]  ;;  %v119_v25 = vld [vmem:[%s1116_s3 + $0x20] sm:$0xff]  ;;  %v105_v28 = vld [vmem:[#allocation3 + $0xb8] sm:$0xff] }
  0x3c   :  { %705 = vmatprep.subr.bf16.mxu0 %v893_v0  ;;  %v120_v26 = vld [vmem:[%s1116_s3 + $0x28] sm:$0xff]  ;;  %v736_v29 = vpack.c.bf16 %v87_v24, %v86_v22  ;;  %v88_v31 = vld [vmem:[#allocation3 + $0x30] sm:$0xff]  ;;  %v738_v32 = vpack.c.bf16 %v105_v28, %v104_v27  ;;  %v89_v33 = vld [vmem:[#allocation3 + $0x38] sm:$0xff] }
  0x3d   :  { %v709_v30 = vpack.c.bf16 %v120_v26, %v119_v25  ;;  %v121_v34 = vld [vmem:[%s1116_s3 + $0x30] sm:$0xff]  ;;  %v122_v35 = vld [vmem:[%s1116_s3 + $0x38] sm:$0xff]  ;;  %v106_v36 = vld [vmem:[#allocation3 + $0xc0] sm:$0xff]  ;;  %v740_v38 = vpack.c.bf16 %v89_v33, %v88_v31 }
  0x3e   :  { %733 = vmatpush3.bf16.msra.mxu1 %v732_v18  ;;  %v107_v37 = vld [vmem:[#allocation3 + $0xc8] sm:$0xff]  ;;  %v712_v39 = vpack.c.bf16 %v122_v35, %v121_v34  ;;  %v90_v40 = vld [vmem:[#allocation3 + $0x40] sm:$0xff]  ;;  %v108_v45 = vld [vmem:[#allocation3 + $0xd0] sm:$0xff] }
  0x3f   :  { %707 = vmatpush3.bf16.msra.mxu0 %v706_v19  ;;  %735 = vmatprep.subr.bf16.mxu1 %v734_v23  ;;  %v742_v41 = vpack.c.bf16 %v107_v37, %v106_v36  ;;  %v91_v42 = vld [vmem:[#allocation3 + $0x48] sm:$0xff]  ;;  %v123_v43 = vld [vmem:[%s1116_s3 + $0x40] sm:$0xff]  ;;  %v109_v46 = vld [vmem:[#allocation3 + $0xd8] sm:$0xff] }
  0x40   :  { %708 = vmatprep.subr.bf16.mxu0 %v893_v0  ;;  %v124_v44 = vld [vmem:[%s1116_s3 + $0x48] sm:$0xff]  ;;  %v744_v47 = vpack.c.bf16 %v91_v42, %v90_v40  ;;  %v92_v49 = vld [vmem:[#allocation3 + $0x50] sm:$0xff]  ;;  %v746_v51 = vpack.c.bf16 %v109_v46, %v108_v45  ;;  %v93_v52 = vld [vmem:[#allocation3 + $0x58] sm:$0xff] }
  0x41   :  { %v715_v48 = vpack.c.bf16 %v124_v44, %v123_v43  ;;  %v81_v50 = vld [vmem:[%s1113_s0 + $0x8] sm:$0xff]  ;;  %v125_v53 = vld [vmem:[%s1116_s3 + $0x50] sm:$0xff]  ;;  %v126_v54 = vld [vmem:[%s1116_s3 + $0x58] sm:$0xff]  ;;  %v748_v57 = vpack.c.bf16 %v93_v52, %v92_v49 }
  0x42   :  { %737 = vmatpush3.bf16.msra.mxu1 %v736_v29  ;;  %v110_v55 = vld [vmem:[#allocation3 + $0xe0] sm:$0xff]  ;;  %v111_v56 = vld [vmem:[#allocation3 + $0xe8] sm:$0xff]  ;;  %265 = vmatprep.mubr.f32.mxu1 %v81_v50  ;;  %v718_v58 = vpack.c.bf16 %v126_v54, %v125_v53  ;;  %v112_v2 = vld [vmem:[#allocation3 + $0xf0] sm:$0xff] }
  0x43   :  { %710 = vmatpush3.bf16.msra.mxu0 %v709_v30  ;;  %739 = vmatprep.subr.bf16.mxu1 %v738_v32  ;;  %v94_v59 = vld [vmem:[#allocation3 + $0x60] sm:$0xff]  ;;  %v750_v60 = vpack.c.bf16 %v111_v56, %v110_v55  ;;  %v95_v61 = vld [vmem:[#allocation3 + $0x68] sm:$0xff]  ;;  %v113_v3 = vld [vmem:[#allocation3 + $0xf8] sm:$0xff] }
  0x44   :  { %711 = vmatprep.subr.bf16.mxu0 %v893_v0  ;;  %v127_v62 = vld [vmem:[%s1116_s3 + $0x60] sm:$0xff]  ;;  %v128_v63 = vld [vmem:[%s1116_s3 + $0x68] sm:$0xff]  ;;  %v752_v4 = vpack.c.bf16 %v95_v61, %v94_v59  ;;  %v96_v6 = vld [vmem:[#allocation3 + $0x70] sm:$0xff]  ;;  %v754_v7 = vpack.c.bf16 %v113_v3, %v112_v2 }
  0x45   :  { %v721_v5 = vpack.c.bf16 %v128_v63, %v127_v62  ;;  %v97_v8 = vld [vmem:[#allocation3 + $0x78] sm:$0xff]  ;;  %v129_v9 = vld [vmem:[%s1116_s3 + $0x70] sm:$0xff]  ;;  %v281_v13 = vld [vmem:[#allocation5] sm:$0xff] }
  0x46   :  { %741 = vmatpush3.bf16.msra.mxu1 %v740_v38  ;;  %v130_v10 = vld [vmem:[%s1116_s3 + $0x78] sm:$0xff]  ;;  %v756_v11 = vpack.c.bf16 %v97_v8, %v96_v6  ;;  %v282_v14 = vld [vmem:[#allocation5 + $0x8] sm:$0xff]  ;;  %v80_v15 = vld [vmem:[%s1113_s0] sm:$0xff] }
  0x47   :  { %713 = vmatpush3.bf16.msra.mxu0 %v712_v39  ;;  %743 = vmatprep.subr.bf16.mxu1 %v742_v41  ;;  %v724_v12 = vpack.c.bf16 %v130_v10, %v129_v9  ;;  %v114_v16 = vld [vmem:[%s1114_s1] sm:$0xff]  ;;  %v759_v17 = vpack.c.bf16 %v282_v14, %v281_v13  ;;  %v283_v18 = vld [vmem:[#allocation5 + $0x10] sm:$0xff]  ;;  %v284_v19 = vld [vmem:[#allocation5 + $0x18] sm:$0xff] }
  0x48   :  { %714 = vmatprep.subr.bf16.mxu0 %v893_v0  ;;  %v762_v20 = vpack.c.bf16 %v284_v19, %v283_v18  ;;  %v285_v21 = vld [vmem:[#allocation5 + $0x20] sm:$0xff]  ;;  %v286_v22 = vld [vmem:[#allocation5 + $0x28] sm:$0xff]  ;;  %v287_v24 = vld [vmem:[#allocation5 + $0x30] sm:$0xff] }
  0x49   :  { %v765_v23 = vpack.c.bf16 %v286_v22, %v285_v21  ;;  %v288_v25 = vld [vmem:[#allocation5 + $0x38] sm:$0xff]  ;;  %v289_v27 = vld [vmem:[#allocation5 + $0x40] sm:$0xff]  ;;  %v290_v28 = vld [vmem:[#allocation5 + $0x48] sm:$0xff] }
  0x4a   :  { %745 = vmatpush3.bf16.msra.mxu1 %v744_v47  ;;  %v768_v26 = vpack.c.bf16 %v288_v25, %v287_v24  ;;  %v771_v29 = vpack.c.bf16 %v290_v28, %v289_v27  ;;  %v292_v30 = vld [vmem:[#allocation5 + $0x58] sm:$0xff]  ;;  %v293_v32 = vld [vmem:[#allocation5 + $0x60] sm:$0xff]  ;;  %v294_v33 = vld [vmem:[#allocation5 + $0x68] sm:$0xff] }
  0x4b   :  { %716 = vmatpush3.bf16.msra.mxu0 %v715_v48  ;;  %747 = vmatprep.subr.bf16.mxu1 %v746_v51  ;;  %v777_v34 = vpack.c.bf16 %v294_v33, %v293_v32  ;;  %v295_v35 = vld [vmem:[#allocation5 + $0x70] sm:$0xff]  ;;  %v296_v36 = vld [vmem:[#allocation5 + $0x78] sm:$0xff]  ;;  %v376_v38 = vld [vmem:[#allocation7] sm:$0xff] }
  0x4c   :  { %717 = vmatprep.subr.bf16.mxu0 %v893_v0  ;;  %v780_v37 = vpack.c.bf16 %v296_v36, %v295_v35  ;;  %v377_v39 = vld [vmem:[#allocation7 + $0x8] sm:$0xff]  ;;  %v378_v40 = vld [vmem:[#allocation7 + $0x10] sm:$0xff]  ;;  %v379_v42 = vld [vmem:[#allocation7 + $0x18] sm:$0xff] }
  0x4d   :  { %v783_v41 = vpack.c.bf16 %v377_v39, %v376_v38  ;;  %v786_v43 = vpack.c.bf16 %v379_v42, %v378_v40  ;;  %v380_v44 = vld [vmem:[#allocation7 + $0x20] sm:$0xff]  ;;  %v381_v45 = vld [vmem:[#allocation7 + $0x28] sm:$0xff]  ;;  %v382_v47 = vld [vmem:[#allocation7 + $0x30] sm:$0xff] }
  0x4e   :  { %749 = vmatpush3.bf16.msra.mxu1 %v748_v57  ;;  %v789_v46 = vpack.c.bf16 %v381_v45, %v380_v44  ;;  %v383_v48 = vld [vmem:[#allocation7 + $0x38] sm:$0xff]  ;;  %v384_v50 = vld [vmem:[#allocation7 + $0x40] sm:$0xff]  ;;  %v385_v51 = vld [vmem:[#allocation7 + $0x48] sm:$0xff] }
  0x4f   :  { %719 = vmatpush3.bf16.msra.mxu0 %v718_v58  ;;  %751 = vmatprep.subr.bf16.mxu1 %v750_v60  ;;  %v792_v49 = vpack.c.bf16 %v383_v48, %v382_v47  ;;  %v795_v52 = vpack.c.bf16 %v385_v51, %v384_v50  ;;  %v386_v53 = vld [vmem:[#allocation7 + $0x50] sm:$0xff]  ;;  %v387_v54 = vld [vmem:[#allocation7 + $0x58] sm:$0xff]  ;;  %v506_v61 = vld [vmem:[%s1117_s4] ss:$0 sm:$0xff] }
  0x50   :  { %720 = vmatprep.subr.bf16.mxu0 %v893_v0  ;;  %v798_v55 = vpack.c.bf16 %v387_v54, %v386_v53  ;;  %v391_v8 = vld [vmem:[#allocation7 + $0x78] sm:$0xff]  ;;  %v507_v10 = vld [vmem:[%s1119_s6] ss:$0 sm:$0xff] }
  0x52   :  { %753 = vmatpush3.bf16.msra.mxu1 %v752_v4  ;;  %v388_v4 = vld [vmem:[#allocation7 + $0x60] sm:$0xff] }
  0x53   :  { %722 = vmatpush3.bf16.msra.mxu0 %v721_v5  ;;  %755 = vmatprep.subr.bf16.mxu1 %v754_v7  ;;  %v389_v5 = vld [vmem:[#allocation7 + $0x68] sm:$0xff]  ;;  %v390_v7 = vld [vmem:[#allocation7 + $0x70] sm:$0xff] }
  0x54   :  { %723 = vmatprep.subr.bf16.mxu0 %v893_v0  ;;  %v801_v6 = vpack.c.bf16 %v389_v5, %v388_v4  ;;  %v804_v9 = vpack.c.bf16 %v391_v8, %v390_v7 }
  0x56   :  { %757 = vmatpush3.bf16.msra.mxu1 %v756_v11 }
  0x57   :  { %725 = vmatpush3.bf16.msra.mxu0 %v724_v12  ;;  %782 = vmatprep.subr.bf16.mxu1 %v893_v0 }
  0x58   :  { %758 = vmatprep.subr.bf16.mxu0 %v893_v0 }
  0x59   :  { %266 = vmatmul.mubr.f32.vlgmr.msra.gmra.mrb[0].mxu1 %v80_v15 }
  0x5a   :  { %630 = vmatmul.mubr.f32.vlgmr.msra.gmra.mrb[0].mxu0 %v114_v16  ;;  %699 = vmatprep.mubr.msk.f32.mxu1 %vm894_vm0, %v895_v1  ;;  %v508_v16 = vld [vmem:[%s1121_s8] ss:$0 sm:$0xff] }
  0x5b   :  { %760 = vmatpush3.bf16.msra.mxu0 %v759_v17  ;;  %664 = vmatprep.mubr.msk.f32.mxu0 %vm894_vm0, %v895_v1  ;;  %v291_v1 = vld [vmem:[#allocation5 + $0x50] sm:$0xff] }
  0x5c   :  { %761 = vmatprep.subr.bf16.mxu0 %v893_v0  ;;  %v774_v31 = vpack.c.bf16 %v292_v30, %v291_v1  ;;  %784 = vmatpush3.bf16.msra.mxu1 %v783_v41 }
  0x5d   :  { %785 = vmatprep.subr.bf16.mxu1 %v893_v0 }
  0x5f   :  { %763 = vmatpush3.bf16.msra.mxu0 %v762_v20  ;;  %v509_v20 = vld [vmem:[%s1122_s9] ss:$0 sm:$0xff] }
  0x60   :  { %764 = vmatprep.subr.bf16.mxu0 %v893_v0  ;;  %787 = vmatpush3.bf16.msra.mxu1 %v786_v43 }
  0x61   :  { %788 = vmatprep.subr.bf16.mxu1 %v893_v0 }
  0x63   :  { %766 = vmatpush3.bf16.msra.mxu0 %v765_v23  ;;  %v482_v23 = vstv %s1123_s10 }
  0x64   :  { %767 = vmatprep.subr.bf16.mxu0 %v893_v0  ;;  %790 = vmatpush3.bf16.msra.mxu1 %v789_v46 }
  0x65   :  { %791 = vmatprep.subr.bf16.mxu1 %v893_v0 }
  0x67   :  { %769 = vmatpush3.bf16.msra.mxu0 %v768_v26 }
  0x68   :  { %770 = vmatprep.subr.bf16.mxu0 %v893_v0  ;;  %793 = vmatpush3.bf16.msra.mxu1 %v792_v49 }
  0x69   :  { %794 = vmatprep.subr.bf16.mxu1 %v893_v0 }
  0x6b   :  { %772 = vmatpush3.bf16.msra.mxu0 %v771_v29  ;;  %v491_v29 = vlaneseq }
  0x6c   :  { %773 = vmatprep.subr.bf16.mxu0 %v893_v0  ;;  %796 = vmatpush3.bf16.msra.mxu1 %v795_v52 }
  0x6d   :  { %797 = vmatprep.subr.bf16.mxu1 %v893_v0  ;;  %v492_v1 = vand.u32 127, %v491_v29  ;;  %v494_v30 = vshrl.u32 %v491_v29, 7 }
  0x6f   :  { %775 = vmatpush3.bf16.msra.mxu0 %v774_v31  ;;  %v495_v31 = vsub.s32 %v492_v1, %v494_v30 }
  0x70   :  { %776 = vmatprep.subr.bf16.mxu0 %v893_v0  ;;  %799 = vmatpush3.bf16.msra.mxu1 %v798_v55 }
  0x71   :  { %800 = vmatprep.subr.bf16.mxu1 %v893_v0 }
  0x73   :  { %778 = vmatpush3.bf16.msra.mxu0 %v777_v34 }
  0x74   :  { %779 = vmatprep.subr.bf16.mxu0 %v893_v0  ;;  %802 = vmatpush3.bf16.msra.mxu1 %v801_v6 }
  0x75   :  { %803 = vmatprep.subr.bf16.mxu1 %v893_v0 }
  0x77   :  { %781 = vmatpush3.bf16.msra.mxu0 %v780_v37 }
  0x78   :  { %805 = vmatpush3.bf16.msra.mxu1 %v804_v9 }
 0x12c   :  { %v560_v56 = vpop.f32.mrb[0].mxu1 }
 0x12d   :  { %v197_v57 = vpop.f32.mrb[0].mxu0  ;;  %v561_v58 = vpop.f32.mrb[1].mxu1 }
 0x12e   :  { %v631_v59 = vpop.f32.mrb[1].mxu0  ;;  %v562_v60 = vadd.f32 %v561_v58, %v560_v56 }
 0x130   :  { %v268_v62 = vadd.f32 %v562_v60, %v197_v57 }
 0x132   :  { %v278_v63 = vadd.f32 %v506_v61, %v268_v62 }
 0x134   :  { %v279_v2 = vmul.f32 0.2, %v278_v63 }
 0x136   :  { %v280_v3 = vmax.f32 %v278_v63, %v279_v2 }
 0x138   :  { %665 = vmatmul.mubr.f32.vlgmr.msra.gmra.mrb[2].mxu0 %v280_v3 }
 0x20b   :  { %v370_v11 = vpop.f32.mrb[2].mxu0 }
 0x20c   :  { %v371_v12 = vadd.f32 %v507_v10, %v370_v11  ;;  %v666_v13 = vpop.f32.mrb[3].mxu0 }
 0x20e   :  { %v374_v14 = vmul.f32 0.2, %v371_v12 }
 0x210   :  { %v375_v15 = vmax.f32 %v371_v12, %v374_v14 }
 0x212   :  { %700 = vmatmul.mubr.f32.vlgmr.msra.gmra.mrb[2].mxu1 %v375_v15 }
 0x2e5   :  { %v465_v17 = vpop.f32.mrb[2].mxu1 }
 0x2e6   :  { %v466_v0 = vadd.f32 %v508_v16, %v465_v17  ;;  %v701_v18 = vpop.f32.mrb[3].mxu1 }
 0x2e8   :  { %v469_v19 = vmul.f32 0.2, %v466_v0 }
 0x2ea   :  { %v470_v21 = vmax.f32 %v466_v0, %v469_v19 }
 0x2ec   :  { %v478_v22 = vmul.f32 %v509_v20, %v470_v21 }
 0x2ee   :  { %479 = vadd.xlane.f32.xlu0 %v478_v22 }
 0x37b   :  { %v480_v24 = vpop.xlane.xlu0 %479 }
 0x37c   :  { %v483_v25 = vadd.f32 %v482_v23, %v480_v24 }
 0x37e   :  { %v510_v26 = vmul.f32 -1.442695, %v483_v25 }
 0x380   :  { %814 = vpow2.f32 %v510_v26 }
 0x38a   :  { %v815_v27 = vpop.eup %814 }
 0x38b   :  { %v487_v28 = vadd.f32 1.0, %v815_v27 }
 0x38d   :  { %816 = vrcp.f32 %v487_v28 }
 0x397   :  { %v817_v32 = vpop.eup %816 }
 0x398   :  { %v496_v33 = vrot.slane %v817_v32, %v495_v31 }
 0x39a   :  { %499 = vst.msk [vmem:[%s1124_s11] sm:$0x1] %vm498_vm1, %v496_v33 }
 0x39b   :  { %504 = vsyncpa [#allocation4], 1 }
 0x39c   :  { %505 = vsyncpa [#allocation6], 1 }

</bundles_post_ra>
